<compile_context>
chip_gen: v6e
topology: v6e:2x2x1
jax: 0.10.0
libtpu: 0.0.40
codegen_flags: <defaults>
</compile_context>

<pallas_src>
import functools

import jax
import jax.numpy as jnp
from jax.experimental import pallas as pl
from jax.experimental.pallas import tpu as pltpu


def _round_up(a, b):
    return ((a + b - 1) // b) * b


# ---------------------------------------------------------------------------
# Kernel: fused 3-layer MLP. Shape-generic in the leading (row/batch) dim.
#   x_ref  : (M, 27)  bf16
#   w1_ref : (27, 36) bf16     b1_ref : (1, 36) f32
#   w2_ref : (36, 36) bf16     b2_ref : (1, 36) f32
#   w3_ref : (36, 16) bf16     b3_ref : (1, 16) f32  (policy 0:9 | value 9 | 0)
#   out_ref: (M, 16)  f32      cols 0:9 softmax(policy), col 9 tanh(value)
# ---------------------------------------------------------------------------
def _fused_mlp_kernel(x_ref, w1_ref, w2_ref, w3_ref, b1_ref, b2_ref, b3_ref,
                      out_ref):
    x = x_ref[...]                                                   # (M, 27)

    h = jnp.dot(x, w1_ref[...], preferred_element_type=jnp.float32) + b1_ref[...]
    h = jnp.where(h > 0, h, 0.01 * h)                                # leaky_relu

    h = jnp.dot(h.astype(jnp.bfloat16), w2_ref[...],
                preferred_element_type=jnp.float32) + b2_ref[...]
    h = jnp.where(h > 0, h, 0.01 * h)

    head = jnp.dot(h.astype(jnp.bfloat16), w3_ref[...],
                   preferred_element_type=jnp.float32) + b3_ref[...]  # (M, 16)

    # Masked softmax over the 9 policy columns, tanh on the value column,
    # written directly as (M, 16) — no concat, no slice stores.
    col = jax.lax.broadcasted_iota(jnp.int32, head.shape, 1)
    logits = jnp.where(col < 9, head, jnp.float32(-1e30))
    m = jnp.max(logits, axis=-1, keepdims=True)
    e = jnp.exp(logits - m)                                           # 0 on masked cols
    s = jnp.sum(e, axis=-1, keepdims=True)
    p = e * pl.reciprocal(s, approx=True)

    out_ref[...] = jnp.where(col == 9, jnp.tanh(head), p)


# ---------------------------------------------------------------------------
# Parameter handling
# ---------------------------------------------------------------------------
def init_params(key):
    """nn.Linear-style init: W (out, in), b (out,), U(-1/sqrt(in), 1/sqrt(in))."""
    def linear(key, in_dim, out_dim):
        kw, kb = jax.random.split(key)
        bound = 1.0 / jnp.sqrt(jnp.float32(in_dim))
        w = jax.random.uniform(kw, (out_dim, in_dim), jnp.float32, -bound, bound)
        b = jax.random.uniform(kb, (out_dim,), jnp.float32, -bound, bound)
        return w, b

    k1, k2, k3, k4 = jax.random.split(key, 4)
    return (
        linear(k1, 27, 36),   # fc1
        linear(k2, 36, 36),   # fc2
        linear(k3, 36, 9),    # policy_head
        linear(k4, 36, 1),    # value_head
    )


def pack_params(params):
    """Transpose weights to (in, out), fuse both heads, cast weights to bf16."""
    (w1, b1), (w2, b2), (wp, bp), (wv, bv) = params

    w3 = jnp.zeros((36, 16), jnp.float32)
    w3 = w3.at[:, :9].set(wp.T)            # policy cols 0:9
    w3 = w3.at[:, 9].set(wv[0])            # value col 9
    b3 = jnp.zeros((1, 16), jnp.float32)
    b3 = b3.at[0, :9].set(bp)
    b3 = b3.at[0, 9].set(bv[0])

    return (
        w1.T.astype(jnp.bfloat16),          # (27, 36)
        w2.T.astype(jnp.bfloat16),          # (36, 36)
        w3.astype(jnp.bfloat16),            # (36, 16)
        b1.reshape(1, 36).astype(jnp.float32),
        b2.reshape(1, 36).astype(jnp.float32),
        b3,                                 # (1, 16) f32
    )


# ---------------------------------------------------------------------------
# Batched forward: grid over the batch, "parallel" so v7x splits it over TCs.
# ---------------------------------------------------------------------------
def network_forward_batched(x, packed_params, tm=1024):
    w1, w2, w3, b1, b2, b3 = packed_params
    n = x.shape[0]
    x2 = jnp.reshape(x, (n, 27)).astype(jnp.bfloat16)

    n8 = _round_up(n, 8)
    # Tile rows: multiple of 8, big (amortize ~0.35us/step), but keep >= 2 grid
    # steps when possible so v7x's two TensorCores both get work.
    tm = max(8, min(_round_up(tm, 8), _round_up((n8 + 1) // 2, 8)))
    n_pad = _round_up(n, tm)
    if n_pad != n:
        x2 = jnp.zeros((n_pad, 27), jnp.bfloat16).at[:n].set(x2)

    out = pl.pallas_call(
        _fused_mlp_kernel,
        out_shape=jax.ShapeDtypeStruct((n_pad, 16), jnp.float32),
        grid=(n_pad // tm,),
        in_specs=[
            pl.BlockSpec((tm, 27), lambda i: (i, 0)),
            # Constant-index-map weight/bias operands: DMA'd once, never re-fetched.
            pl.BlockSpec((27, 36), lambda i: (0, 0)),
            pl.BlockSpec((36, 36), lambda i: (0, 0)),
            pl.BlockSpec((36, 16), lambda i: (0, 0)),
            pl.BlockSpec((1, 36), lambda i: (0, 0)),
            pl.BlockSpec((1, 36), lambda i: (0, 0)),
            pl.BlockSpec((1, 16), lambda i: (0, 0)),
        ],
        out_specs=pl.BlockSpec((tm, 16), lambda i: (i, 0)),
        compiler_params=pltpu.CompilerParams(
            dimension_semantics=("parallel",)),
    )(x2, w1, w2, w3, b1, b2, b3)

    return out[:n, :9], out[:n, 9:10]      # (n, 9), (n, 1)


# ---------------------------------------------------------------------------
# Single-sample forward (matches Network.forward): routes through the same
# kernel at tm=8 (batching leaf evals is the real lever at M=1).
# ---------------------------------------------------------------------------
def network_forward(x, packed_params):
    p, v = network_forward_batched(jnp.reshape(x, (1, 27)), packed_params, tm=8)
    return p[0], v[0]                       # policy (9,), value (1,)


# ---------------------------------------------------------------------------
# Pure-JAX references (for correctness check only)
# ---------------------------------------------------------------------------
def reference_forward(x, params):
    """f32 reference mirroring the PyTorch module exactly."""
    (w1, b1), (w2, b2), (wp, bp), (wv, bv) = params
    h = jnp.reshape(x, (1, 27)).astype(jnp.float32)
    h = h @ w1.T + b1
    h = jnp.where(h > 0, h, 0.01 * h)
    h = h @ w2.T + b2
    h = jnp.where(h > 0, h, 0.01 * h)
    logits = (h @ wp.T + bp).reshape(9)
    v = (h @ wv.T + bv).reshape(1)
    e = jnp.exp(logits - jnp.max(logits))
    return e / jnp.sum(e), jnp.tanh(v)


def reference_forward_matched(x2, packed_params):
    """Reference using the same bf16-rounded operands as the kernel."""
    w1, w2, w3, b1, b2, b3 = packed_params
    h = x2.astype(jnp.bfloat16)
    h = jnp.dot(h, w1, preferred_element_type=jnp.float32) + b1
    h = jnp.where(h > 0, h, 0.01 * h)
    h = jnp.dot(h.astype(jnp.bfloat16), w2, preferred_element_type=jnp.float32) + b2
    h = jnp.where(h > 0, h, 0.01 * h)
    head = jnp.dot(h.astype(jnp.bfloat16), w3, preferred_element_type=jnp.float32) + b3
    logits = head[:, :9]
    v = head[:, 9:10]
    e = jnp.exp(logits - jnp.max(logits, axis=-1, keepdims=True))
    return e / jnp.sum(e, axis=-1, keepdims=True), jnp.tanh(v)


if __name__ == "__main__":
    key = jax.random.PRNGKey(0)
    k_params, k_x, k_batch = jax.random.split(key, 3)

    params = init_params(k_params)
    packed = pack_params(params)

    fwd = jax.jit(network_forward)
    fwd_batched = jax.jit(functools.partial(network_forward_batched, tm=1024))

    # ---- single board (matches torch Network.forward semantics) ----
    x = jax.random.normal(k_x, (3, 3, 3), jnp.float32)   # 27 elems -> view(1,27)
    policy, value = fwd(x, packed)

    # ---- batched throughput path (e.g. MCTS leaf evaluation) ----
    xb = jax.random.normal(k_batch, (256, 3, 3, 3), jnp.float32)
    pol_b, val_b = fwd_batched(xb, packed)

    jax.block_until_ready((policy, value, pol_b, val_b))

    # sanity + reference checks
    assert policy.shape == (9,) and value.shape == (1,)

    # vs. reference with matched bf16 numerics (tight)
    ref_pm, ref_vm = reference_forward_matched(jnp.reshape(x, (1, 27)), packed)
    assert float(jnp.max(jnp.abs(policy - ref_pm[0]))) < 2e-3
    assert float(jnp.max(jnp.abs(value - ref_vm[0]))) < 2e-3

    # vs. full-f32 PyTorch-equivalent reference (loose: bf16 operands)
    ref_p, ref_v = reference_forward(x, params)
    assert float(jnp.max(jnp.abs(policy - ref_p))) < 3e-2
    assert float(jnp.max(jnp.abs(value - ref_v))) < 3e-2

    assert abs(float(jnp.sum(policy)) - 1.0) < 5e-3       # approx reciprocal
    assert -1.0001 <= float(value[0]) <= 1.0001

    assert pol_b.shape == (256, 9) and val_b.shape == (256, 1)
    assert bool(jnp.all(jnp.abs(jnp.sum(pol_b, axis=-1) - 1.0) < 5e-3))
    assert bool(jnp.all(jnp.abs(val_b) <= 1.0001))

    # batched path agrees with single-sample path on the same board
    p0, v0 = network_forward_batched(jnp.reshape(x, (1, 27)), packed, tm=8)
    jax.block_until_ready((p0, v0))
    assert float(jnp.max(jnp.abs(p0[0] - policy))) < 1e-5
    assert float(jnp.max(jnp.abs(v0[0] - value))) < 1e-5

    print("KERNEL_OK")
</pallas_src>

<mosaic_0001>
module attributes {stable_mosaic.version = 11 : i64} {
  func.func @_fused_mlp_kernel(%arg0: i32, %arg1: memref<8x27xbf16, #tpu.memory_space<vmem>>, %arg2: memref<27x36xbf16, #tpu.memory_space<vmem>>, %arg3: memref<36x36xbf16, #tpu.memory_space<vmem>>, %arg4: memref<36x16xbf16, #tpu.memory_space<vmem>>, %arg5: memref<1x36xf32, #tpu.memory_space<vmem>>, %arg6: memref<1x36xf32, #tpu.memory_space<vmem>>, %arg7: memref<1x16xf32, #tpu.memory_space<vmem>>, %arg8: memref<8x16xf32, #tpu.memory_space<vmem>>) attributes {dimension_semantics = [#tpu.dimension_semantics<parallel>], iteration_bounds = array<i64: 1>, scalar_prefetch = 0 : i64, scratch_operands = 0 : i64, tpu.core_type = #tpu.core_type<tc>, window_params = [{transform_indices = @transform_0, window_bounds = array<i64: 8, 27>}, {pipeline_mode = #tpu.pipeline_mode<synchronous>, transform_indices = @transform_1, window_bounds = array<i64: 27, 36>}, {pipeline_mode = #tpu.pipeline_mode<synchronous>, transform_indices = @transform_2, window_bounds = array<i64: 36, 36>}, {pipeline_mode = #tpu.pipeline_mode<synchronous>, transform_indices = @transform_3, window_bounds = array<i64: 36, 16>}, {pipeline_mode = #tpu.pipeline_mode<synchronous>, transform_indices = @transform_4, window_bounds = array<i64: 1, 36>}, {pipeline_mode = #tpu.pipeline_mode<synchronous>, transform_indices = @transform_5, window_bounds = array<i64: 1, 36>}, {pipeline_mode = #tpu.pipeline_mode<synchronous>, transform_indices = @transform_6, window_bounds = array<i64: 1, 16>}, {transform_indices = @transform_7, window_bounds = array<i64: 8, 16>}]} {
    %c0 = arith.constant 0 : index
    %c0_0 = arith.constant 0 : index
    %0 = vector.load %arg1[%c0, %c0_0] : memref<8x27xbf16, #tpu.memory_space<vmem>>, vector<8x27xbf16>
    %c0_1 = arith.constant 0 : index
    %c0_2 = arith.constant 0 : index
    %1 = vector.load %arg2[%c0_1, %c0_2] : memref<27x36xbf16, #tpu.memory_space<vmem>>, vector<27x36xbf16>
    %cst = arith.constant dense<0.000000e+00> : vector<8x36xf32>
    %2 = tpu.matmul %0, %1, %cst {dimension_numbers = #tpu.dot_dimension_numbers<[1], [0], [0], [1], [0, 0, 1, 1], [], []>} : vector<8x27xbf16>, vector<27x36xbf16>, vector<8x36xf32> -> vector<8x36xf32>
    %c0_3 = arith.constant 0 : index
    %c0_4 = arith.constant 0 : index
    %3 = vector.load %arg5[%c0_3, %c0_4] : memref<1x36xf32, #tpu.memory_space<vmem>>, vector<1x36xf32>
    %4 = vector.broadcast %3 : vector<1x36xf32> to vector<8x36xf32>
    %5 = arith.addf %2, %4 : vector<8x36xf32>
    %cst_5 = arith.constant 0.000000e+00 : f32
    %6 = vector.broadcast %cst_5 : f32 to vector<8x36xf32>
    %7 = arith.cmpf ogt, %5, %6 : vector<8x36xf32>
    %cst_6 = arith.constant 0.00999999977 : f32
    %8 = vector.broadcast %cst_6 : f32 to vector<8x36xf32>
    %9 = arith.mulf %8, %5 : vector<8x36xf32>
    %10 = arith.select %7, %5, %9 : vector<8x36xi1>, vector<8x36xf32>
    %11 = arith.truncf %10 : vector<8x36xf32> to vector<8x36xbf16>
    %c0_7 = arith.constant 0 : index
    %c0_8 = arith.constant 0 : index
    %12 = vector.load %arg3[%c0_7, %c0_8] : memref<36x36xbf16, #tpu.memory_space<vmem>>, vector<36x36xbf16>
    %cst_9 = arith.constant dense<0.000000e+00> : vector<8x36xf32>
    %13 = tpu.matmul %11, %12, %cst_9 {dimension_numbers = #tpu.dot_dimension_numbers<[1], [0], [0], [1], [0, 0, 1, 1], [], []>} : vector<8x36xbf16>, vector<36x36xbf16>, vector<8x36xf32> -> vector<8x36xf32>
    %c0_10 = arith.constant 0 : index
    %c0_11 = arith.constant 0 : index
    %14 = vector.load %arg6[%c0_10, %c0_11] : memref<1x36xf32, #tpu.memory_space<vmem>>, vector<1x36xf32>
    %15 = vector.broadcast %14 : vector<1x36xf32> to vector<8x36xf32>
    %16 = arith.addf %13, %15 : vector<8x36xf32>
    %cst_12 = arith.constant 0.000000e+00 : f32
    %17 = vector.broadcast %cst_12 : f32 to vector<8x36xf32>
    %18 = arith.cmpf ogt, %16, %17 : vector<8x36xf32>
    %cst_13 = arith.constant 0.00999999977 : f32
    %19 = vector.broadcast %cst_13 : f32 to vector<8x36xf32>
    %20 = arith.mulf %19, %16 : vector<8x36xf32>
    %21 = arith.select %18, %16, %20 : vector<8x36xi1>, vector<8x36xf32>
    %22 = arith.truncf %21 : vector<8x36xf32> to vector<8x36xbf16>
    %c0_14 = arith.constant 0 : index
    %c0_15 = arith.constant 0 : index
    %23 = vector.load %arg4[%c0_14, %c0_15] : memref<36x16xbf16, #tpu.memory_space<vmem>>, vector<36x16xbf16>
    %cst_16 = arith.constant dense<0.000000e+00> : vector<8x16xf32>
    %24 = tpu.matmul %22, %23, %cst_16 {dimension_numbers = #tpu.dot_dimension_numbers<[1], [0], [0], [1], [0, 0, 1, 1], [], []>} : vector<8x36xbf16>, vector<36x16xbf16>, vector<8x16xf32> -> vector<8x16xf32>
    %c0_17 = arith.constant 0 : index
    %c0_18 = arith.constant 0 : index
    %25 = vector.load %arg7[%c0_17, %c0_18] : memref<1x16xf32, #tpu.memory_space<vmem>>, vector<1x16xf32>
    %26 = vector.broadcast %25 : vector<1x16xf32> to vector<8x16xf32>
    %27 = arith.addf %24, %26 : vector<8x16xf32>
    %28 = tpu.iota {dimensions = array<i32: 1>} : vector<8x16xi32>
    %c9_i32 = arith.constant 9 : i32
    %29 = vector.broadcast %c9_i32 : i32 to vector<8x16xi32>
    %30 = arith.cmpi slt, %28, %29 : vector<8x16xi32>
    %cst_19 = arith.constant -1.000000e+30 : f32
    %31 = vector.broadcast %cst_19 : f32 to vector<8x16xf32>
    %32 = arith.select %30, %27, %31 : vector<8x16xi1>, vector<8x16xf32>
    %cst_20 = arith.constant dense<0xFF800000> : vector<8xf32>
    %33 = vector.multi_reduction <maximumf>, %32, %cst_20 [1] : vector<8x16xf32> to vector<8xf32>
    %34 = vector.shape_cast %33 : vector<8xf32> to vector<8x1xf32>
    %35 = vector.broadcast %34 : vector<8x1xf32> to vector<8x16xf32>
    %36 = arith.subf %32, %35 : vector<8x16xf32>
    %37 = math.exp %36 : vector<8x16xf32>
    %cst_21 = arith.constant dense<0.000000e+00> : vector<8xf32>
    %38 = vector.multi_reduction <add>, %37, %cst_21 [1] : vector<8x16xf32> to vector<8xf32>
    %39 = vector.shape_cast %38 : vector<8xf32> to vector<8x1xf32>
    %40 = tpu.reciprocal %39 {approx = true} : vector<8x1xf32> -> vector<8x1xf32>
    %41 = vector.broadcast %40 : vector<8x1xf32> to vector<8x16xf32>
    %42 = arith.mulf %37, %41 : vector<8x16xf32>
    %c9_i32_22 = arith.constant 9 : i32
    %43 = vector.broadcast %c9_i32_22 : i32 to vector<8x16xi32>
    %44 = arith.cmpi eq, %28, %43 : vector<8x16xi32>
    %45 = math.tanh %27 : vector<8x16xf32>
    %46 = arith.select %44, %45, %42 : vector<8x16xi1>, vector<8x16xf32>
    %c0_23 = arith.constant 0 : index
    %c0_24 = arith.constant 0 : index
    %47 = vector.load %arg8[%c0_23, %c0_24] : memref<8x16xf32, #tpu.memory_space<vmem>>, vector<8x16xf32>
    tpu.vector_store %arg8[%c0_23, %c0_24], %46 {strides = array<i32>} : memref<8x16xf32, #tpu.memory_space<vmem>>, vector<8x16xf32>,
    return
  }
  func.func @transform_0(%arg0: i32) -> (i32, i32) {
    %c0_i32 = arith.constant 0 : i32
    %c0_i32_0 = arith.constant 0 : i32
    return %arg0, %c0_i32 : i32, i32
  }
  func.func @transform_1(%arg0: i32) -> (i32, i32) {
    %c0_i32 = arith.constant 0 : i32
    %c0_i32_0 = arith.constant 0 : i32
    %c0_i32_1 = arith.constant 0 : i32
    return %c0_i32, %c0_i32_0 : i32, i32
  }
  func.func @transform_2(%arg0: i32) -> (i32, i32) {
    %c0_i32 = arith.constant 0 : i32
    %c0_i32_0 = arith.constant 0 : i32
    %c0_i32_1 = arith.constant 0 : i32
    return %c0_i32, %c0_i32_0 : i32, i32
  }
  func.func @transform_3(%arg0: i32) -> (i32, i32) {
    %c0_i32 = arith.constant 0 : i32
    %c0_i32_0 = arith.constant 0 : i32
    %c0_i32_1 = arith.constant 0 : i32
    return %c0_i32, %c0_i32_0 : i32, i32
  }
  func.func @transform_4(%arg0: i32) -> (i32, i32) {
    %c0_i32 = arith.constant 0 : i32
    %c0_i32_0 = arith.constant 0 : i32
    %c0_i32_1 = arith.constant 0 : i32
    return %c0_i32, %c0_i32_0 : i32, i32
  }
  func.func @transform_5(%arg0: i32) -> (i32, i32) {
    %c0_i32 = arith.constant 0 : i32
    %c0_i32_0 = arith.constant 0 : i32
    %c0_i32_1 = arith.constant 0 : i32
    return %c0_i32, %c0_i32_0 : i32, i32
  }
  func.func @transform_6(%arg0: i32) -> (i32, i32) {
    %c0_i32 = arith.constant 0 : i32
    %c0_i32_0 = arith.constant 0 : i32
    %c0_i32_1 = arith.constant 0 : i32
    return %c0_i32, %c0_i32_0 : i32, i32
  }
  func.func @transform_7(%arg0: i32) -> (i32, i32) {
    %c0_i32 = arith.constant 0 : i32
    %c0_i32_0 = arith.constant 0 : i32
    return %arg0, %c0_i32 : i32, i32
  }
}

</mosaic_0001>

<bundles_post_ra>
// kernel: network_forward.1
= control target key start
LH: loop header
LB: loop body
LE: loop exit
PB: predicated region body
PF: predicated region fallthrough
CT: control target
= control target key end

     0   :  { %vm54_vm0 = vcmask 1044480   ;;  %vm55_vm1 = vcmask 1045504   ;;  %v351_v0 = vmov 0.0   ;;  %v352_v2 = vmov 65535   ;;  %s443_s1 = inlined_call_operand.vmem [shape: bf16[27,36], index: 1, kind: input, shape index: {}]   ;;  %s444_s2 = inlined_call_operand.vmem [shape: bf16[36,36], index: 2, kind: input, shape index: {}]   ;;  %s445_s3 = inlined_call_operand.vmem [shape: bf16[36,16], index: 3, kind: input, shape index: {}]   ;;  %s446_s0 = inlined_call_operand.vmem [shape: bf16[8,27], index: 0, kind: input, shape index: {}]   ;;  %s447_s4 = inlined_call_operand.vmem [shape: f32[1,36], index: 4, kind: input, shape index: {}]   ;;  %s448_s5 = inlined_call_operand.vmem [shape: f32[1,36], index: 5, kind: input, shape index: {}]   ;;  %s449_s6 = inlined_call_operand.vmem [shape: f32[1,16], index: 6, kind: input, shape index: {}]   ;;  %s450_s7 = inlined_call_operand.vmem [shape: f32[8,16], index: 7, kind: output, shape index: {}]  }
   0x1   :  { %306 = vmatprep.subr.bf16.mxu0 %v351_v0  ;;  %v337_v1 = vld [vmem:[%s443_s1 + $0x8] sm:$0x3f]   ;;  %314 = vmatprep.subr.bf16.mxu1 %v351_v0  ;;  %v56_v3 = vsel %vm54_vm0, 4294967295, %v352_v2  ;;  %vm136_vm2 = vcmask 1041408   ;;  %vm353_vm3 = vmmov 0   ;;  %v338_v7 = vld [vmem:[%s443_s1] sm:$0xff]   ;;  %v257_v34 = vlaneseq }
   0x2   :  { %v57_v4 = vsel %vm55_vm1, %v56_v3, 0  ;;  %310 = vmatprep.mubr.msk.bf16.mxu0 %vm353_vm3, %v351_v0  ;;  %v339_v6 = vld [vmem:[%s444_s2 + $0x10] ss:$0 sps:$4 sm:$0x33]   ;;  %320 = vmatprep.mubr.msk.bf16.mxu1 %vm353_vm3, %v351_v0  ;;  %v27_v10 = vld [vmem:[%s446_s0] sm:$0xf] }
   0x3   :  { %v59_v5 = vand.u32 %v337_v1, %v57_v4  ;;  %v138_v8 = vsel %vm136_vm2, %v339_v6, 0  ;;  %v340_v9 = vld [vmem:[%s445_s3 + $0x10] ss:$0 sps:$4 sm:$0x33]   ;;  %vm50_vm4 = vcmask 220160   ;;  %v341_v12 = vld [vmem:[%s444_s2 + $0x8] sm:$0xff]  }
   0x4   :  { %315 = vmatpush3.bf16.msra.mxu1 %v138_v8  ;;  %v215_v11 = vsel %vm136_vm2, %v340_v9, 0  ;;  %v342_v13 = vld [vmem:[%s444_s2] sm:$0xff]   ;;  %vm132_vm6 = vcmask 293888   ;;  %v343_v23 = vld [vmem:[%s445_s3 + $0x8] sm:$0xff]   ;;  %v258_v35 = vand.u32 127, %v257_v34  ;;  %vm261_vm9 = vcmask 130048  }
   0x5   :  { %307 = vmatpush3.bf16.msra.mxu0 %v59_v5  ;;  %316 = vmatprep.subr.bf16.mxu1 %v351_v0  ;;  %v281_v14 = vld [vmem:[%s447_s4] ss:$0 sm:$0xff] }
   0x6   :  { %308 = vmatprep.subr.bf16.mxu0 %v351_v0  ;;  %v344_v24 = vld [vmem:[%s445_s3] sm:$0xff]   ;;  %vm259_vm8 = vcmp.lt.s32.totalorder %v258_v35, 9  ;;  %vm273_vm10 = vcmp.eq.s32.totalorder %v258_v35, 9 }
   0x7   :  { %v285_v25 = vld [vmem:[%s448_s5] ss:$0 sm:$0xff] }
   0x8   :  { %317 = vmatpush3.bf16.msra.mxu1 %v341_v12  ;;  %v290_v36 = vld [vmem:[%s449_s6] ss:$0 sm:$0xff] }
   0x9   :  { %309 = vmatpush3.bf16.msra.mxu0 %v338_v7  ;;  %318 = vmatprep.subr.bf16.mxu1 %v351_v0 }
   0xa   :  { %324 = vmatprep.subr.bf16.mxu0 %v351_v0 }
   0xc   :  { %311 = vmatmul.mubr.msk.bf16.vlgmr.msra.gmra.mxu0 %vm50_vm4, %v27_v10  ;;  %319 = vmatpush3.bf16.msra.mxu1 %v342_v13 }
   0xd   :  { %325 = vmatpush3.bf16.msra.mxu0 %v215_v11  ;;  %330 = vmatprep.mubr.msk.bf16.mxu0 %vm353_vm3, %v351_v0 }
   0xe   :  { %326 = vmatprep.subr.bf16.mxu0 %v351_v0 }
  0x11   :  { %327 = vmatpush3.bf16.msra.mxu0 %v343_v23 }
  0x12   :  { %328 = vmatprep.subr.bf16.mxu0 %v351_v0 }
  0x15   :  { %329 = vmatpush3.bf16.msra.mxu0 %v344_v24 }
  0xcc   :  { %v95_v15 = vpop.f32.mrf.mxu0 }
  0xcd   :  { %v96_v16 = vadd.f32 %v281_v14, %v95_v15 }
  0xce   :  { %v312_v17 = vpop.f32.mrf.mxu0 }
  0xcf   :  { %vm101_vm5 = vcmp.gt.f32.partialorder %v96_v16, 0.0  ;;  %v102_v18 = vmul.f32 0.01, %v96_v16 }
  0xd0   :  { %v98_v19 = vpop.f32.mrf.mxu0 }
  0xd1   :  { %v103_v20 = vsel %vm101_vm5, %v96_v16, %v102_v18 }
  0xd2   :  { %v104_v21 = vpack.c.bf16 %v103_v20, %v103_v20  ;;  %v313_v22 = vpop.f32.mrf.mxu0 }
  0xd4   :  { %321 = vmatmul.mubr.msk.bf16.vlgmr.msra.gmra.mxu1 %vm132_vm6, %v104_v21 }
 0x194   :  { %v174_v26 = vpop.f32.mrf.mxu1 }
 0x195   :  { %v175_v27 = vadd.f32 %v285_v25, %v174_v26 }
 0x196   :  { %v322_v28 = vpop.f32.mrf.mxu1 }
 0x197   :  { %vm180_vm7 = vcmp.gt.f32.partialorder %v175_v27, 0.0  ;;  %v181_v29 = vmul.f32 0.01, %v175_v27 }
 0x198   :  { %v177_v30 = vpop.f32.mrf.mxu1 }
 0x199   :  { %v182_v31 = vsel %vm180_vm7, %v175_v27, %v181_v29 }
 0x19a   :  { %v183_v32 = vpack.c.bf16 %v182_v31, %v182_v31  ;;  %v323_v33 = vpop.f32.mrf.mxu1 }
 0x19c   :  { %331 = vmatmul.mubr.msk.bf16.vlgmr.msra.gmra.mxu0 %vm132_vm6, %v183_v32 }
 0x25c   :  { %v251_v37 = vpop.f32.mrf.mxu0 }
 0x25d   :  { %v252_v38 = vadd.f32 %v290_v36, %v251_v37 }
 0x25e   :  { %v332_v39 = vpop.f32.mrf.mxu0 }
 0x25f   :  { %v260_v40 = vsel %vm259_vm8, %v252_v38, -1e+30 }
 0x260   :  { %v254_v41 = vpop.f32.mrf.mxu0  ;;  %v262_v42 = vsel %vm261_vm9, %v260_v40, -inf }
 0x261   :  { %263 = vmax.xlane.f32.xlu0 %v262_v42 }
 0x262   :  { %v333_v43 = vpop.f32.mrf.mxu0 }
 0x2ea   :  { %v264_v44 = vpop.xlane.xlu0 %263 }
 0x2eb   :  { %v265_v45 = vsub.f32 %v260_v40, %v264_v44 }
 0x2ed   :  { %v266_v46 = vmul.f32 1.442695, %v265_v45 }
 0x2ef   :  { %345 = vpow2.f32 %v266_v46 }
 0x2fc   :  { %v346_v47 = vpop.eup %345 }
 0x2fd   :  { %v268_v48 = vsel %vm261_vm9, %v346_v47, 0.0 }
 0x2fe   :  { %269 = vadd.xlane.f32.xlu0 %v268_v48 }
 0x387   :  { %v270_v49 = vpop.xlane.xlu0 %269 }
 0x388   :  { %347 = vrcp.f32 %v270_v49 }
 0x389   :  { %349 = vtanh.f32 %v252_v38 }
 0x395   :  { %v348_v50 = vpop.eup %347 }
 0x396   :  { %v272_v51 = vmul.f32 %v348_v50, %v346_v47  ;;  %v350_v52 = vpop.eup %349 }
 0x398   :  { %v275_v53 = vsel %vm273_vm10, %v350_v52, %v272_v51 }
 0x399   :  { %276 = vst.msk [vmem:[%s450_s7] sm:$0xff] %vm261_vm9, %v275_v53 }

</bundles_post_ra>
